<compile_context>
chip_gen: v6e
topology: v6e:2x2x1
jax: 0.10.0
libtpu: 0.0.40
codegen_flags: <defaults>
</compile_context>

<pallas_src>
import functools

import jax
import jax.numpy as jnp
from jax.experimental import pallas as pl
from jax.experimental.pallas import tpu as pltpu


_LANE = 128
_SUBLANE = 8
_TARGET_BLOCK_BYTES = 2 * 1024 * 1024    # ~2 MiB per x/out block
_MAX_BLOCK_L = 8192                      # lanes per L tile (multiple of 128)


def _round_up(a, b):
    return (a + b - 1) // b * b


def _softplus(z):
    # numerically-stable softplus, matches torch.nn.functional.softplus
    return jnp.maximum(z, 0.0) + jnp.log1p(jnp.exp(-jnp.abs(z)))


def _laplacian_nll0d_kernel(x_ref, scale_ref, o_ref, *, scale_lb, aux_weight,
                            scale_init):
    # x_ref:     [block_r, block_l]  native-dtype tile of x
    # scale_ref: [block_r, 1]        raw predicted scale (f32) for these rows
    # o_ref:     [block_r, block_l]  output tile (same dtype as x)
    s = _softplus(scale_ref[...] + scale_init) + scale_lb          # [block_r, 1]
    inv_s = 1.0 / s                                                # per-row, exact
    log_term = aux_weight * jnp.log(2.0 * s)                       # [block_r, 1]
    xf = jnp.abs(x_ref[...].astype(jnp.float32))
    o_ref[...] = (xf * inv_s + log_term).astype(o_ref.dtype)


def laplacian_nll0d(x, scale, *, scale_lb=0.0001, aux_weight=1.0,
                    scale_init=0.5413):
    """x: [b, num_recs, h, w]; scale: [b, num_recs, 1, 1, 1] -> [b, num_recs, h, w]."""
    b, nr, h, w = x.shape
    assert scale.shape[0] == b and scale.shape[1] == nr
    R, L = b * nr, h * w

    out_dtype = x.dtype if jnp.issubdtype(x.dtype, jnp.floating) else jnp.float32
    itemsize = max(jnp.dtype(x.dtype).itemsize, jnp.dtype(out_dtype).itemsize)

    # --- tile sizing (VMEM-budgeted, lane-dense) ---
    L_aligned = _round_up(L, _LANE)
    block_l = min(L_aligned, _MAX_BLOCK_L)           # multiple of 128
    Lp = _round_up(L, block_l)

    R_aligned = _round_up(R, _SUBLANE)
    max_rows = max(
        _SUBLANE,
        (_TARGET_BLOCK_BYTES // (block_l * itemsize)) // _SUBLANE * _SUBLANE)
    block_r = min(R_aligned, max_rows)               # multiple of 8
    Rp = _round_up(R, block_r)

    grid = (Rp // block_r, Lp // block_l)

    # --- prepare 2-D views (no dtype cast of x: keep I/O bytes minimal) ---
    x2 = x.reshape(R, L)
    s2 = scale.reshape(R, 1).astype(jnp.float32)
    if (Rp, Lp) != (R, L):
        x2 = jnp.pad(x2, ((0, Rp - R), (0, Lp - L)))
    if Rp != R:
        s2 = jnp.pad(s2, ((0, Rp - R), (0, 0)))

    kernel = functools.partial(
        _laplacian_nll0d_kernel,
        scale_lb=float(scale_lb),
        aux_weight=float(aux_weight),
        scale_init=float(scale_init),
    )

    out = pl.pallas_call(
        kernel,
        out_shape=jax.ShapeDtypeStruct((Rp, Lp), out_dtype),
        grid_spec=pltpu.PrefetchScalarGridSpec(
            num_scalar_prefetch=0,
            grid=grid,
            in_specs=[
                pl.BlockSpec((block_r, block_l), lambda i, j: (i, j)),
                pl.BlockSpec((block_r, 1), lambda i, j: (i, 0)),
            ],
            out_specs=pl.BlockSpec((block_r, block_l), lambda i, j: (i, j)),
        ),
        compiler_params=pltpu.CompilerParams(
            dimension_semantics=("parallel", "parallel")),
    )(x2, s2)

    if (Rp, Lp) != (R, L):
        out = out[:R, :L]
    return out.reshape(b, nr, h, w)


def _reference(x, scale, scale_lb=0.0001, aux_weight=1.0, scale_init=0.5413):
    s = jax.nn.softplus(scale.astype(jnp.float32) + scale_init) + scale_lb
    s = jnp.squeeze(s, axis=2)                       # [b, nr, 1, 1]
    return jnp.abs(x.astype(jnp.float32)) / s + aux_weight * jnp.log(2.0 * s)


if __name__ == "__main__":
    key = jax.random.PRNGKey(0)
    kx, ks, kx2, ks2 = jax.random.split(key, 4)

    # Main check: aligned shapes.
    b, num_recs, h, w = 2, 4, 16, 16
    x = jax.random.normal(kx, (b, num_recs, h, w), dtype=jnp.float32)
    scale = jax.random.normal(ks, (b, num_recs, 1, 1, 1), dtype=jnp.float32)

    out = jax.block_until_ready(laplacian_nll0d(x, scale))
    ref = _reference(x, scale)
    assert out.shape == (b, num_recs, h, w)
    assert jnp.allclose(out, ref, atol=1e-5, rtol=1e-5), (
        f"max abs err {jnp.max(jnp.abs(out - ref))}")

    # Robustness check: R and L not multiples of (8, 128) -> padding path.
    b2, nr2, h2, w2 = 2, 3, 5, 7
    xo = jax.random.normal(kx2, (b2, nr2, h2, w2), dtype=jnp.float32)
    so = jax.random.normal(ks2, (b2, nr2, 1, 1, 1), dtype=jnp.float32)
    out2 = jax.block_until_ready(laplacian_nll0d(xo, so))
    ref2 = _reference(xo, so)
    assert out2.shape == (b2, nr2, h2, w2)
    assert jnp.allclose(out2, ref2, atol=1e-5, rtol=1e-5), (
        f"max abs err {jnp.max(jnp.abs(out2 - ref2))}")

    print("KERNEL_OK")
</pallas_src>

<mosaic_0001>
module attributes {stable_mosaic.version = 11 : i64} {
  func.func @_laplacian_nll0d_kernel(%arg0: i32, %arg1: i32, %arg2: memref<8x256xf32, #tpu.memory_space<vmem>>, %arg3: memref<8x1xf32, #tpu.memory_space<vmem>>, %arg4: memref<8x256xf32, #tpu.memory_space<vmem>>) attributes {dimension_semantics = [#tpu.dimension_semantics<parallel>, #tpu.dimension_semantics<parallel>], iteration_bounds = array<i64: 1, 1>, scalar_prefetch = 0 : i64, scratch_operands = 0 : i64, tpu.core_type = #tpu.core_type<tc>, window_params = [{transform_indices = @transform_0, window_bounds = array<i64: 8, 256>}, {transform_indices = @transform_1, window_bounds = array<i64: 8, 1>}, {transform_indices = @transform_2, window_bounds = array<i64: 8, 256>}]} {
    %c0 = arith.constant 0 : index
    %c0_0 = arith.constant 0 : index
    %0 = vector.load %arg3[%c0, %c0_0] : memref<8x1xf32, #tpu.memory_space<vmem>>, vector<8x1xf32>
    %cst = arith.constant 5.413000e-01 : f32
    %1 = vector.broadcast %cst : f32 to vector<8x1xf32>
    %2 = arith.addf %0, %1 : vector<8x1xf32>
    %cst_1 = arith.constant 0.000000e+00 : f32
    %3 = vector.broadcast %cst_1 : f32 to vector<8x1xf32>
    %4 = arith.maximumf %2, %3 : vector<8x1xf32>
    %5 = math.absf %2 : vector<8x1xf32>
    %cst_2 = arith.constant 0.000000e+00 : f32
    %6 = vector.broadcast %cst_2 : f32 to vector<8x1xf32>
    %7 = arith.subf %6, %5 : vector<8x1xf32>
    %8 = math.exp %7 : vector<8x1xf32>
    %9 = math.log1p %8 : vector<8x1xf32>
    %10 = arith.addf %4, %9 : vector<8x1xf32>
    %cst_3 = arith.constant 9.99999974E-5 : f32
    %11 = vector.broadcast %cst_3 : f32 to vector<8x1xf32>
    %12 = arith.addf %10, %11 : vector<8x1xf32>
    %cst_4 = arith.constant 1.000000e+00 : f32
    %13 = vector.broadcast %cst_4 : f32 to vector<8x1xf32>
    %14 = arith.divf %13, %12 : vector<8x1xf32>
    %cst_5 = arith.constant 2.000000e+00 : f32
    %15 = vector.broadcast %cst_5 : f32 to vector<8x1xf32>
    %16 = arith.mulf %15, %12 : vector<8x1xf32>
    %17 = math.log %16 : vector<8x1xf32>
    %cst_6 = arith.constant 1.000000e+00 : f32
    %18 = vector.broadcast %cst_6 : f32 to vector<8x1xf32>
    %19 = arith.mulf %18, %17 : vector<8x1xf32>
    %c0_7 = arith.constant 0 : index
    %c0_8 = arith.constant 0 : index
    %20 = vector.load %arg2[%c0_7, %c0_8] : memref<8x256xf32, #tpu.memory_space<vmem>>, vector<8x256xf32>
    %21 = math.absf %20 : vector<8x256xf32>
    %22 = vector.broadcast %14 : vector<8x1xf32> to vector<8x256xf32>
    %23 = arith.mulf %21, %22 : vector<8x256xf32>
    %24 = vector.broadcast %19 : vector<8x1xf32> to vector<8x256xf32>
    %25 = arith.addf %23, %24 : vector<8x256xf32>
    %c0_9 = arith.constant 0 : index
    %c0_10 = arith.constant 0 : index
    %26 = vector.load %arg4[%c0_9, %c0_10] : memref<8x256xf32, #tpu.memory_space<vmem>>, vector<8x256xf32>
    tpu.vector_store %arg4[%c0_9, %c0_10], %25 {strides = array<i32>} : memref<8x256xf32, #tpu.memory_space<vmem>>, vector<8x256xf32>,
    return
  }
  func.func @transform_0(%arg0: i32, %arg1: i32) -> (i32, i32) {
    %c0_i32 = arith.constant 0 : i32
    return %arg0, %arg1 : i32, i32
  }
  func.func @transform_1(%arg0: i32, %arg1: i32) -> (i32, i32) {
    %c0_i32 = arith.constant 0 : i32
    %c0_i32_0 = arith.constant 0 : i32
    return %arg0, %c0_i32 : i32, i32
  }
  func.func @transform_2(%arg0: i32, %arg1: i32) -> (i32, i32) {
    %c0_i32 = arith.constant 0 : i32
    return %arg0, %arg1 : i32, i32
  }
}

</mosaic_0001>

<bundles_post_ra>
// kernel: tpu_custom_call.1
= control target key start
LH: loop header
LB: loop body
LE: loop exit
PB: predicated region body
PF: predicated region fallthrough
CT: control target
= control target key end

     0   :  { %7 = vsyncpa [#allocation3], 0  ;;  %s165_s0 = inlined_call_operand.hbm [shape: f32[8,256], index: 0, kind: input, shape index: {}]   ;;  %s166_s1 = inlined_call_operand.vmem [shape: f32[8,1], index: 1, kind: input, shape index: {}]   ;;  %s167_s2 = inlined_call_operand.hbm [shape: f32[8,256], index: 2, kind: output, shape index: {}]  }
   0x1   :  { %8 = vsyncpa [#allocation4], 0  ;;  %s138_s9 = smov [#allocation2]  }
   0x2   :  { %s15_s10 = sshll.u32 %s138_s9, 4  ;;  %s16_s10 = int_to_ptr.vmem [resolvable:$true] %s15_s10 }
   0x3   :  { %s102_s11 = scalar_lea.vmem %s16_s10, 256  ;;  %p107_p1 = scmp.lt.s32.totalorder %s16_s10, %s16_s10 }
   0x4   :  { %p103_p0 = scmp.ne.s32.totalorder %s16_s10, %s102_s11  ;;  %p108_p2 = scmp.lt.s32.totalorder %s102_s11, %s102_s11 }
   0x6   :  { %p109_p3 = por %p108_p2, %p107_p1 }
   0x8   :  { %p110_p4 = pnand %p109_p3, %p103_p0 }
   0xa   :  { %113 = shalt.err (!%p110_p4)
}
   0xb   :  { %18 = dma.hbm_to_vmem [thread:$0]  %s165_s0, 256, %s16_s10, [#allocation3]  }
   0xc   :  { %134 = dma.done.wait [#allocation3], 256  }
   0xd   :  { %135 = vsyncadd [#allocation3], 4294967040  ;;  %v139_v0 = vmov 0   ;;  %v24_v1 = vld [vmem:[%s166_s1] sm:$0xff]  ;;  %v48_v23 = vld [vmem:[#allocation2 + $0x8] sm:$0xff]  ;;  %s140_s0 = smov [#allocation5]  }
   0xe   :  { %85 = vset.pattern.permute.xlu0 %v139_v0  ;;  %v25_v2 = vadd.f32 0.5413, %v24_v1  ;;  %v47_v22 = vld [vmem:[#allocation2] sm:$0xff]  ;;  %v50_v25 = vand.u32 2147483647, %v48_v23  ;;  %s73_s1 = sshll.u32 %s140_s0, 4  ;;  %s74_s1 = int_to_ptr.vmem [resolvable:$true] %s73_s1 }
   0xf   :  { %v49_v24 = vand.u32 2147483647, %v47_v22  ;;  %s114_s16 = scalar_lea.vmem %s74_s1, 256  ;;  %p119_p6 = scmp.lt.s32.totalorder %s74_s1, %s74_s1 }
  0x10   :  { %v27_v3 = vand.u32 2147483647, %v25_v2  ;;  %v26_v13 = vmax.f32 %v25_v2, 0.0  ;;  %p115_p5 = scmp.ne.s32.totalorder %s74_s1, %s114_s16  ;;  %p120_p7 = scmp.lt.s32.totalorder %s114_s16, %s114_s16 }
  0x12   :  { %v28_v4 = vsub.f32 0.0, %v27_v3  ;;  %p121_p8 = por %p120_p7, %p119_p6 }
  0x14   :  { %v29_v5 = vmul.f32 1.442695, %v28_v4  ;;  %p122_p9 = pnand %p121_p8, %p115_p5 }
  0x16   :  { %86 = vpow2.f32 %v29_v5 }
  0x23   :  { %v87_v6 = vpop.eup %86 }
  0x24   :  { %v31_v7 = vadd.f32 1.0, %v87_v6  ;;  %v34_v8 = vmul.f32 -0.5, %v87_v6  ;;  %v37_v10 = vand.u32 2147483647, %v87_v6 }
  0x26   :  { %88 = vlog2.f32 %v31_v7  ;;  %v35_v9 = vadd.f32 1.0, %v34_v8  ;;  %vm38_vm0 = vcmp.lt.f32.partialorder %v37_v10, 0.0004427343 }
  0x28   :  { %v36_v11 = vmul.f32 %v87_v6, %v35_v9 }
  0x33   :  { %v89_v12 = vpop.eup %88 }
  0x34   :  { %v33_v14 = vmul.f32 0.6931472, %v89_v12 }
  0x36   :  { %v39_v15 = vsel %vm38_vm0, %v36_v11, %v33_v14 }
  0x37   :  { %v40_v16 = vadd.f32 %v39_v15, %v26_v13 }
  0x39   :  { %v41_v17 = vadd.f32 0.0001, %v40_v16 }
  0x3b   :  { %90 = vrcp.f32 %v41_v17  ;;  %v44_v18 = vmul.f32 2.0, %v41_v17 }
  0x3d   :  { %92 = vlog2.f32 %v44_v18 }
  0x48   :  { %v91_v19 = vpop.eup %90 }
  0x49   :  { %53 = vperm.xlu0 %85, %v91_v19  }
  0x4a   :  { %v93_v20 = vpop.eup %92 }
  0x4b   :  { %v46_v21 = vmul.f32 0.6931472, %v93_v20 }
  0x4d   :  { %60 = vperm.xlu0 %85, %v46_v21  }
  0xc4   :  { %v54_v26 = vpop.permute.xlu0 %53 }
  0xc5   :  { %v56_v27 = vmul.f32 %v54_v26, %v49_v24  ;;  %v57_v28 = vmul.f32 %v54_v26, %v50_v25 }
  0xc8   :  { %v61_v29 = vpop.permute.xlu0 %60 }
  0xc9   :  { %v63_v30 = vadd.f32 %v61_v29, %v56_v27  ;;  %v64_v31 = vadd.f32 %v61_v29, %v57_v28 }
  0xcb   :  { %65 = vst [vmem:[#allocation5] sm:$0xff] %v63_v30  ;;  %66 = vst [vmem:[#allocation5 + $0x8] sm:$0xff] %v64_v31 }
  0xcc   :  { %125 = shalt.err (!%p122_p9)
}
  0xcd   :  { %76 = dma.vmem_to_hbm [thread:$0]  %s74_s1, 256, %s167_s2, [#allocation4]  }
  0xce   :  { %136 = dma.done.wait [#allocation4], 256  }
  0xcf   :  { %137 = vsyncadd [#allocation4], 4294967040 }
  0xd0   :  { %80 = vsyncpa [#allocation3], 1 }
  0xd1   :  { %81 = vsyncpa [#allocation4], 1 }

</bundles_post_ra>
